<compile_context>
chip_gen: v6e
topology: v6e:2x2x1
jax: 0.10.0
libtpu: 0.0.40
codegen_flags: <defaults>
</compile_context>

<pallas_src>
import jax
import jax.numpy as jnp
from jax.experimental import pallas as pl
from jax.experimental.pallas import tpu as pltpu

# Small, shape-consistent sizes.
B = 2          # batch
SEQ = 128      # x row dim; becomes last dim after permute (must be >= 96)
D_IN = 64      # linear1 in_features (x feature dim)
H1 = 32        # linear1 out_features
H2 = 16        # linear2 out_features (dead code in the reference forward)
CAT = 43 + 2   # linear3 in_features: slice 53:96 (43) + index_select([52,95]) (2)
M = B * SEQ    # batch folded into the matmul row dim (256)


def _fused_kernel(xf_ref, w1_ref, b1_ref, wm_ref, b3_ref, o_ref):
    """Single-launch fused forward.

    xf: (M, D_IN)   x reshaped to (B*SEQ, D_IN)
    w1: (H1, D_IN)  torch Linear layout (out_features, in_features)
    b1: (1, H1)
    wm: (B, M)      block-diagonal fold of linear3's weight over the SEQ axis
    b3: (1,)        linear3 bias (SMEM scalar)
    o : (B, H1)
    """
    # v1 (batch flattened into M): x @ w1.T + b1 — K-K contraction, no transpose copy.
    v1 = jax.lax.dot_general(
        xf_ref[...], w1_ref[...],
        dimension_numbers=(((1,), (1,)), ((), ())),
        preferred_element_type=jnp.float32,
    ) + b1_ref[...]                                           # (M, H1)

    # Folded permute(0,2,1) + slice(53:96) + index_select([52,95]) + concat +
    # Linear(45,1): one (B, M) x (M, H1) contraction over the SEQ axis.
    v7 = jnp.dot(wm_ref[...], v1,
                 preferred_element_type=jnp.float32) + b3_ref[0]   # (B, H1)
    o_ref[...] = v7.astype(o_ref.dtype)


def _fold_linear3(w3):
    """Fold slice(53:96) + index_select([52, 95]) + cat + Linear(45, 1) into a
    single SEQ-wide weight, then block-diagonalize over batch so the reduction
    rides the flattened M axis.  Column 95 appears in BOTH the slice and the
    index_select, so its two weights accumulate."""
    wfold = jnp.zeros((SEQ,), jnp.float32)
    wfold = wfold.at[53:96].add(w3[0, 0:43])   # slice 53:96  -> w3 cols 0..42
    wfold = wfold.at[52].add(w3[0, 43])        # index_select elem 0 (s=52)
    wfold = wfold.at[95].add(w3[0, 44])        # index_select elem 1 (s=95), accumulated
    wm = jnp.zeros((B, M), jnp.float32)
    for b in range(B):                         # static, B=2
        wm = wm.at[b, b * SEQ:(b + 1) * SEQ].set(wfold)
    return wm


def init_params(key):
    k1, k2, k3, k4, k5, k6 = jax.random.split(key, 6)
    w1 = 0.02 * jax.random.normal(k1, (H1, D_IN), jnp.float32)
    b1 = 0.02 * jax.random.normal(k2, (H1,), jnp.float32)
    # linear2 is declared (like the torch module) but its output (v3/v4) never
    # reaches the return value, so the fused kernel skips that matmul.
    w2 = 0.02 * jax.random.normal(k3, (H2, SEQ), jnp.float32)
    b2 = 0.02 * jax.random.normal(k4, (H2,), jnp.float32)
    w3 = 0.02 * jax.random.normal(k5, (1, CAT), jnp.float32)
    b3 = 0.02 * jax.random.normal(k6, (1,), jnp.float32)
    return (w1, b1, w2, b2, w3, b3)


@jax.jit
def forward(x, params):
    w1, b1, w2, b2, w3, b3 = params
    del w2, b2          # dead code in the reference forward (v3/v4 unused)
    xf = x.reshape(M, D_IN)
    wm = _fold_linear3(w3)
    out = pl.pallas_call(
        _fused_kernel,
        out_shape=jax.ShapeDtypeStruct((B, H1), jnp.float32),
        in_specs=[
            pl.BlockSpec(memory_space=pltpu.MemorySpace.VMEM),   # xf (M, D_IN)
            pl.BlockSpec(memory_space=pltpu.MemorySpace.VMEM),   # w1 (H1, D_IN)
            pl.BlockSpec(memory_space=pltpu.MemorySpace.VMEM),   # b1 (1, H1)
            pl.BlockSpec(memory_space=pltpu.MemorySpace.VMEM),   # wm (B, M)
            pl.BlockSpec(memory_space=pltpu.MemorySpace.SMEM),   # b3 (1,) scalar
        ],
        out_specs=pl.BlockSpec(memory_space=pltpu.MemorySpace.VMEM),
    )(xf, w1, b1.reshape(1, H1), wm, b3)
    return out[:, :, None]          # (B, H1, 1) — matches the torch module output


if __name__ == "__main__":
    key = jax.random.PRNGKey(0)
    kx, kp = jax.random.split(key)
    x = jax.random.normal(kx, (B, SEQ, D_IN), jnp.float32)
    params = init_params(kp)

    out = jax.block_until_ready(forward(x, params))

    assert out.shape == (B, H1, 1), out.shape
    assert out.dtype == jnp.float32

    # Pure-JAX reference following the ORIGINAL (unfolded) op graph.
    w1, b1, w2, b2, w3, b3 = params
    v1r = x @ w1.T + b1
    v2r = jnp.transpose(v1r, (0, 2, 1))
    v5r = v2r[:, :, 53:96]
    v6r = jnp.take(v2r, jnp.array([52, 95], dtype=jnp.int32), axis=2)
    v8r = jnp.concatenate((v5r, v6r), axis=2)
    v7r = v8r @ w3.T + b3
    assert jnp.allclose(out, v7r, atol=1e-4, rtol=1e-4), \
        float(jnp.max(jnp.abs(out - v7r)))

    print("KERNEL_OK")
</pallas_src>

<mosaic_0001>
module attributes {stable_mosaic.version = 11 : i64} {
  func.func @_fused_kernel(%arg0: memref<256x64xf32, #tpu.memory_space<vmem>>, %arg1: memref<32x64xf32, #tpu.memory_space<vmem>>, %arg2: memref<1x32xf32, #tpu.memory_space<vmem>>, %arg3: memref<2x256xf32, #tpu.memory_space<vmem>>, %arg4: memref<1xf32, #tpu.memory_space<smem>>, %arg5: memref<2x32xf32, #tpu.memory_space<vmem>>) attributes {dimension_semantics = [], scalar_prefetch = 0 : i64, scratch_operands = 0 : i64, tpu.core_type = #tpu.core_type<tc>} {
    %c0 = arith.constant 0 : index
    %c0_0 = arith.constant 0 : index
    %0 = vector.load %arg0[%c0, %c0_0] : memref<256x64xf32, #tpu.memory_space<vmem>>, vector<256x64xf32>
    %c0_1 = arith.constant 0 : index
    %c0_2 = arith.constant 0 : index
    %1 = vector.load %arg1[%c0_1, %c0_2] : memref<32x64xf32, #tpu.memory_space<vmem>>, vector<32x64xf32>
    %cst = arith.constant dense<0.000000e+00> : vector<256x32xf32>
    %2 = tpu.matmul %0, %1, %cst {dimension_numbers = #tpu.dot_dimension_numbers<[1], [1], [0], [0], [0, 0, 1, 0], [], []>} : vector<256x64xf32>, vector<32x64xf32>, vector<256x32xf32> -> vector<256x32xf32>
    %c0_3 = arith.constant 0 : index
    %c0_4 = arith.constant 0 : index
    %3 = vector.load %arg2[%c0_3, %c0_4] : memref<1x32xf32, #tpu.memory_space<vmem>>, vector<1x32xf32>
    %4 = vector.broadcast %3 : vector<1x32xf32> to vector<256x32xf32>
    %5 = arith.addf %2, %4 : vector<256x32xf32>
    %c0_5 = arith.constant 0 : index
    %c0_6 = arith.constant 0 : index
    %6 = vector.load %arg3[%c0_5, %c0_6] : memref<2x256xf32, #tpu.memory_space<vmem>>, vector<2x256xf32>
    %cst_7 = arith.constant dense<0.000000e+00> : vector<2x32xf32>
    %7 = tpu.matmul %6, %5, %cst_7 {dimension_numbers = #tpu.dot_dimension_numbers<[1], [0], [0], [1], [0, 0, 1, 1], [], []>} : vector<2x256xf32>, vector<256x32xf32>, vector<2x32xf32> -> vector<2x32xf32>
    %c0_8 = arith.constant 0 : index
    %8 = memref.load %arg4[%c0_8] : memref<1xf32, #tpu.memory_space<smem>>
    %9 = vector.broadcast %8 : f32 to vector<2x32xf32>
    %10 = arith.addf %7, %9 : vector<2x32xf32>
    %c0_9 = arith.constant 0 : index
    %c0_10 = arith.constant 0 : index
    %11 = vector.load %arg5[%c0_9, %c0_10] : memref<2x32xf32, #tpu.memory_space<vmem>>, vector<2x32xf32>
    tpu.vector_store %arg5[%c0_9, %c0_10], %10 {strides = array<i32>} : memref<2x32xf32, #tpu.memory_space<vmem>>, vector<2x32xf32>,
    return
  }
}

</mosaic_0001>

<bundles_post_ra>
// kernel: forward.1
= control target key start
LH: loop header
LB: loop body
LE: loop exit
PB: predicated region body
PF: predicated region fallthrough
CT: control target
= control target key end

     0   :  { %vm65_vm0 = vcmask 523264   ;;  %s944_s0 = inlined_call_operand.vmem [shape: f32[256,64], index: 0, kind: input, shape index: {}]   ;;  %s945_s1 = inlined_call_operand.vmem [shape: f32[32,64], index: 1, kind: input, shape index: {}]   ;;  %s946_s2 = inlined_call_operand.vmem [shape: f32[1,32], index: 2, kind: input, shape index: {}]   ;;  %s947_s3 = inlined_call_operand.vmem [shape: f32[2,256], index: 3, kind: input, shape index: {}]   ;;  %s948_s4 = inlined_call_operand.<no memory space> [shape: f32[1], index: 4, kind: input, shape index: {}]   ;;  %s949_s5 = inlined_call_operand.hbm [shape: f32[2,32], index: 5, kind: output, shape index: {}]  }
   0x1   :  { %v57_v0 = vld [vmem:[%s945_s1 + $0x18] sm:$0xff]  ;;  %v56_v1 = vld [vmem:[%s945_s1 + $0x10] sm:$0xff]  ;;  %v22_v2 = vld [vmem:[%s944_s0] sm:$0xff] }
   0x2   :  { %608 = vmatprep.subr.msk.mxu0 %vm65_vm0, %v57_v0  ;;  %616 = vmatprep.mubr.msk.f32.mxu0 %vm65_vm0, %v22_v2  ;;  %v55_v3 = vld [vmem:[%s945_s1 + $0x8] sm:$0xff]  ;;  %v54_v4 = vld [vmem:[%s945_s1] sm:$0xff] }
   0x3   :  { %609 = vmatpush3.xpose.msk.msra.mxu0 %vm65_vm0, %v57_v0 }
   0x4   :  { %610 = vmatprep.subr.msk.mxu0 %vm65_vm0, %v56_v1 }
   0x7   :  { %611 = vmatpush3.xpose.msk.msra.mxu0 %vm65_vm0, %v56_v1 }
   0x8   :  { %612 = vmatprep.subr.msk.mxu0 %vm65_vm0, %v55_v3 }
   0xb   :  { %613 = vmatpush3.xpose.msk.msra.mxu0 %vm65_vm0, %v55_v3 }
   0xc   :  { %614 = vmatprep.subr.msk.mxu0 %vm65_vm0, %v54_v4 }
   0xd   :  { %11 = vsyncpa [#allocation4], 0  ;;  %v23_v5 = vld [vmem:[%s944_s0 + $0x8] sm:$0xff]  ;;  %v24_v6 = vld [vmem:[%s944_s0 + $0x10] sm:$0xff]  ;;  %s687_s15 = smov [#allocation3]   ;;  %vm483_vm1 = vcmask 254976  }
   0xe   :  { %v25_v7 = vld [vmem:[%s944_s0 + $0x18] sm:$0xff]  ;;  %v26_v8 = vld [vmem:[%s944_s0 + $0x20] sm:$0xff]  ;;  %v27_v9 = vld [vmem:[%s944_s0 + $0x28] sm:$0xff]  ;;  %s491_s16 = sshll.u32 %s687_s15, 4  ;;  %s492_s16 = int_to_ptr.vmem [resolvable:$true] %s491_s16 }
   0xf   :  { %615 = vmatpush3.xpose.msk.msra.mxu0 %vm65_vm0, %v54_v4  ;;  %v28_v10 = vld [vmem:[%s944_s0 + $0x30] sm:$0xff]  ;;  %v29_v11 = vld [vmem:[%s944_s0 + $0x38] sm:$0xff]  ;;  %v30_v12 = vld [vmem:[%s944_s0 + $0x40] sm:$0xff]  ;;  %s665_s17 = scalar_lea.vmem %s492_s16, 32  ;;  %p670_p1 = scmp.lt.s32.totalorder %s492_s16, %s492_s16 }
  0x10   :  { %v31_v13 = vld [vmem:[%s944_s0 + $0x48] sm:$0xff]  ;;  %v32_v14 = vld [vmem:[%s944_s0 + $0x50] sm:$0xff]  ;;  %v33_v15 = vld [vmem:[%s944_s0 + $0x58] sm:$0xff]  ;;  %p666_p0 = scmp.ne.s32.totalorder %s492_s16, %s665_s17  ;;  %p671_p2 = scmp.lt.s32.totalorder %s665_s17, %s665_s17 }
  0x11   :  { %v34_v16 = vld [vmem:[%s944_s0 + $0x60] sm:$0xff]  ;;  %v35_v17 = vld [vmem:[%s944_s0 + $0x68] sm:$0xff]  ;;  %v36_v18 = vld [vmem:[%s944_s0 + $0x70] sm:$0xff] }
  0x12   :  { %617 = vmatmul.mubr.msk.f32.vlgmr.msra.gmra.mxu0 %vm65_vm0, %v23_v5  ;;  %v37_v19 = vld [vmem:[%s944_s0 + $0x78] sm:$0xff]  ;;  %v38_v20 = vld [vmem:[%s944_s0 + $0x80] sm:$0xff]  ;;  %v39_v21 = vld [vmem:[%s944_s0 + $0x88] sm:$0xff]  ;;  %p672_p3 = por %p671_p2, %p670_p1 }
  0x13   :  { %619 = vmatprep.mubr.msk.f32.mxu0 %vm65_vm0, %v24_v6  ;;  %v40_v22 = vld [vmem:[%s944_s0 + $0x90] sm:$0xff]  ;;  %v41_v23 = vld [vmem:[%s944_s0 + $0x98] sm:$0xff]  ;;  %v42_v24 = vld [vmem:[%s944_s0 + $0xa0] sm:$0xff] }
  0x14   :  { %v43_v25 = vld [vmem:[%s944_s0 + $0xa8] sm:$0xff]  ;;  %v44_v26 = vld [vmem:[%s944_s0 + $0xb0] sm:$0xff]  ;;  %v45_v27 = vld [vmem:[%s944_s0 + $0xb8] sm:$0xff]  ;;  %p673_p4 = pnand %p672_p3, %p666_p0 }
  0x15   :  { %v46_v28 = vld [vmem:[%s944_s0 + $0xc0] sm:$0xff]  ;;  %v47_v29 = vld [vmem:[%s944_s0 + $0xc8] sm:$0xff]  ;;  %v48_v30 = vld [vmem:[%s944_s0 + $0xd0] sm:$0xff] }
  0x16   :  { %620 = vmatmul.mubr.msk.f32.gmra.mxu0 %vm65_vm0, %v25_v7  ;;  %v49_v31 = vld [vmem:[%s944_s0 + $0xd8] sm:$0xff]  ;;  %v50_v32 = vld [vmem:[%s944_s0 + $0xe0] sm:$0xff]  ;;  %v51_v33 = vld [vmem:[%s944_s0 + $0xe8] sm:$0xff] }
  0x17   :  { %622 = vmatprep.mubr.msk.f32.mxu0 %vm65_vm0, %v26_v8  ;;  %v52_v34 = vld [vmem:[%s944_s0 + $0xf0] sm:$0xff]  ;;  %v53_v35 = vld [vmem:[%s944_s0 + $0xf8] sm:$0xff]  ;;  %v869_v36 = vld.sshfl [vmem:[%s947_s3] sm:$0x33 pattern:$0x76325410] }
  0x18   :  { %v410_v37 = vcombine.high %v869_v36, %v869_v36  ;;  %v894_v4 = vld [vmem:[%s946_s2] ss:$0 sm:$0xff] }
  0x1a   :  { %623 = vmatmul.mubr.msk.f32.gmra.mxu0 %vm65_vm0, %v27_v9  ;;  %477 = vmatprep.mubr.f32.mxu1 %v410_v37 }
  0x1b   :  { %625 = vmatprep.mubr.msk.f32.mxu0 %vm65_vm0, %v28_v10 }
  0x1e   :  { %626 = vmatmul.mubr.msk.f32.gmra.mxu0 %vm65_vm0, %v29_v11 }
  0x1f   :  { %628 = vmatprep.mubr.msk.f32.mxu0 %vm65_vm0, %v30_v12 }
  0x22   :  { %629 = vmatmul.mubr.msk.f32.gmra.mxu0 %vm65_vm0, %v31_v13 }
  0x23   :  { %631 = vmatprep.mubr.msk.f32.mxu0 %vm65_vm0, %v32_v14 }
  0x26   :  { %632 = vmatmul.mubr.msk.f32.gmra.mxu0 %vm65_vm0, %v33_v15 }
  0x27   :  { %634 = vmatprep.mubr.msk.f32.mxu0 %vm65_vm0, %v34_v16 }
  0x2a   :  { %635 = vmatmul.mubr.msk.f32.gmra.mxu0 %vm65_vm0, %v35_v17 }
  0x2b   :  { %637 = vmatprep.mubr.msk.f32.mxu0 %vm65_vm0, %v36_v18 }
  0x2e   :  { %638 = vmatmul.mubr.msk.f32.gmra.mxu0 %vm65_vm0, %v37_v19 }
  0x2f   :  { %640 = vmatprep.mubr.msk.f32.mxu0 %vm65_vm0, %v38_v20 }
  0x32   :  { %641 = vmatmul.mubr.msk.f32.gmra.mxu0 %vm65_vm0, %v39_v21 }
  0x33   :  { %643 = vmatprep.mubr.msk.f32.mxu0 %vm65_vm0, %v40_v22 }
  0x36   :  { %644 = vmatmul.mubr.msk.f32.gmra.mxu0 %vm65_vm0, %v41_v23 }
  0x37   :  { %646 = vmatprep.mubr.msk.f32.mxu0 %vm65_vm0, %v42_v24 }
  0x3a   :  { %647 = vmatmul.mubr.msk.f32.gmra.mxu0 %vm65_vm0, %v43_v25 }
  0x3b   :  { %649 = vmatprep.mubr.msk.f32.mxu0 %vm65_vm0, %v44_v26 }
  0x3e   :  { %650 = vmatmul.mubr.msk.f32.gmra.mxu0 %vm65_vm0, %v45_v27 }
  0x3f   :  { %652 = vmatprep.mubr.msk.f32.mxu0 %vm65_vm0, %v46_v28 }
  0x42   :  { %653 = vmatmul.mubr.msk.f32.gmra.mxu0 %vm65_vm0, %v47_v29 }
  0x43   :  { %655 = vmatprep.mubr.msk.f32.mxu0 %vm65_vm0, %v48_v30 }
  0x46   :  { %656 = vmatmul.mubr.msk.f32.gmra.mxu0 %vm65_vm0, %v49_v31 }
  0x47   :  { %658 = vmatprep.mubr.msk.f32.mxu0 %vm65_vm0, %v50_v32 }
  0x4a   :  { %659 = vmatmul.mubr.msk.f32.gmra.mxu0 %vm65_vm0, %v51_v33 }
  0x4b   :  { %661 = vmatprep.mubr.msk.f32.mxu0 %vm65_vm0, %v52_v34 }
  0x4e   :  { %662 = vmatmul.mubr.msk.f32.gmra.mxu0 %vm65_vm0, %v53_v35 }
  0xd2   :  { %v873_v38 = vpop.f32.mrf.mxu0 }
  0xd3   :  { %v246_v37 = vadd.f32 %v873_v38, %v894_v4 }
  0xd4   :  { %v875_v39 = vpop.f32.mrf.mxu0 }
  0xd6   :  { %v877_v40 = vpop.f32.mrf.mxu0 }
  0xd7   :  { %v256_v32 = vadd.f32 %v877_v40, %v894_v4 }
  0xd8   :  { %v879_v41 = vpop.f32.mrf.mxu0 }
  0xd9   :  { %v251_v34 = vadd.f32 %v894_v4, %v879_v41 }
  0xda   :  { %v881_v42 = vpop.f32.mrf.mxu0 }
  0xdb   :  { %v266_v28 = vadd.f32 %v881_v42, %v894_v4  ;;  %v241_v42 = vadd.f32 %v894_v4, %v875_v39 }
  0xdc   :  { %v883_v43 = vpop.f32.mrf.mxu0 }
  0xdd   :  { %v261_v30 = vadd.f32 %v894_v4, %v883_v43  ;;  %v401_v43 = vstv %s948_s4 }
  0xde   :  { %v627_v44 = vpop.f32.mrf.mxu0 }
  0xdf   :  { %v276_v24 = vadd.f32 %v627_v44, %v894_v4 }
  0xe0   :  { %v270_v45 = vpop.f32.mrf.mxu0 }
  0xe1   :  { %v271_v26 = vadd.f32 %v894_v4, %v270_v45 }
  0xe2   :  { %v630_v46 = vpop.f32.mrf.mxu0 }
  0xe3   :  { %v286_v20 = vadd.f32 %v630_v46, %v894_v4 }
  0xe4   :  { %v280_v47 = vpop.f32.mrf.mxu0 }
  0xe5   :  { %v281_v22 = vadd.f32 %v894_v4, %v280_v47 }
  0xe6   :  { %v633_v48 = vpop.f32.mrf.mxu0 }
  0xe7   :  { %v296_v16 = vadd.f32 %v633_v48, %v894_v4 }
  0xe8   :  { %v290_v49 = vpop.f32.mrf.mxu0 }
  0xe9   :  { %v291_v18 = vadd.f32 %v894_v4, %v290_v49 }
  0xea   :  { %v636_v50 = vpop.f32.mrf.mxu0 }
  0xeb   :  { %v306_v12 = vadd.f32 %v636_v50, %v894_v4 }
  0xec   :  { %v300_v51 = vpop.f32.mrf.mxu0 }
  0xed   :  { %v301_v14 = vadd.f32 %v894_v4, %v300_v51 }
  0xee   :  { %v639_v52 = vpop.f32.mrf.mxu0 }
  0xef   :  { %v316_v7 = vadd.f32 %v639_v52, %v894_v4 }
  0xf0   :  { %v310_v53 = vpop.f32.mrf.mxu0 }
  0xf1   :  { %v311_v10 = vadd.f32 %v894_v4, %v310_v53 }
  0xf2   :  { %v885_v54 = vpop.f32.mrf.mxu0 }
  0xf3   :  { %v326_v35 = vadd.f32 %v885_v54, %v894_v4 }
  0xf4   :  { %v887_v55 = vpop.f32.mrf.mxu0 }
  0xf5   :  { %v321_v40 = vadd.f32 %v894_v4, %v887_v55 }
  0xf6   :  { %v645_v56 = vpop.f32.mrf.mxu0 }
  0xf7   :  { %v336_v31 = vadd.f32 %v645_v56, %v894_v4 }
  0xf8   :  { %v889_v57 = vpop.f32.mrf.mxu0 }
  0xf9   :  { %v331_v33 = vadd.f32 %v894_v4, %v889_v57 }
  0xfa   :  { %v648_v58 = vpop.f32.mrf.mxu0 }
  0xfb   :  { %v346_v27 = vadd.f32 %v648_v58, %v894_v4 }
  0xfc   :  { %v340_v59 = vpop.f32.mrf.mxu0 }
  0xfd   :  { %v341_v29 = vadd.f32 %v894_v4, %v340_v59 }
  0xfe   :  { %v651_v60 = vpop.f32.mrf.mxu0 }
  0xff   :  { %v356_v23 = vadd.f32 %v651_v60, %v894_v4 }
 0x100   :  { %v350_v61 = vpop.f32.mrf.mxu0 }
 0x101   :  { %v351_v25 = vadd.f32 %v894_v4, %v350_v61 }
 0x102   :  { %v654_v62 = vpop.f32.mrf.mxu0 }
 0x103   :  { %v366_v19 = vadd.f32 %v654_v62, %v894_v4 }
 0x104   :  { %v360_v63 = vpop.f32.mrf.mxu0 }
 0x105   :  { %v361_v21 = vadd.f32 %v894_v4, %v360_v63 }
 0x106   :  { %v657_v0 = vpop.f32.mrf.mxu0 }
 0x107   :  { %v376_v15 = vadd.f32 %v657_v0, %v894_v4 }
 0x108   :  { %v370_v1 = vpop.f32.mrf.mxu0 }
 0x109   :  { %v371_v17 = vadd.f32 %v894_v4, %v370_v1 }
 0x10a   :  { %v660_v2 = vpop.f32.mrf.mxu0 }
 0x10b   :  { %v386_v11 = vadd.f32 %v660_v2, %v894_v4 }
 0x10c   :  { %v380_v3 = vpop.f32.mrf.mxu0 }
 0x10d   :  { %v381_v13 = vadd.f32 %v894_v4, %v380_v3 }
 0x10e   :  { %v663_v5 = vpop.f32.mrf.mxu0 }
 0x10f   :  { %v396_v6 = vadd.f32 %v663_v5, %v894_v4 }
 0x110   :  { %v390_v8 = vpop.f32.mrf.mxu0 }
 0x111   :  { %v391_v9 = vadd.f32 %v894_v4, %v390_v8  ;;  %573 = vmatprep.subr.mxu1 %v396_v6 }
 0x112   :  { %574 = vmatpush3.msra.mxu1 %v316_v7 }
 0x113   :  { %575 = vmatprep.subr.mxu1 %v391_v9 }
 0x114   :  { %576 = vmatpush3.msra.mxu1 %v311_v10 }
 0x115   :  { %577 = vmatprep.subr.mxu1 %v386_v11 }
 0x116   :  { %578 = vmatpush3.msra.mxu1 %v306_v12 }
 0x117   :  { %579 = vmatprep.subr.mxu1 %v381_v13 }
 0x118   :  { %580 = vmatpush3.msra.mxu1 %v301_v14 }
 0x119   :  { %581 = vmatprep.subr.mxu1 %v376_v15 }
 0x11a   :  { %582 = vmatpush3.msra.mxu1 %v296_v16 }
 0x11b   :  { %583 = vmatprep.subr.mxu1 %v371_v17 }
 0x11c   :  { %584 = vmatpush3.msra.mxu1 %v291_v18 }
 0x11d   :  { %585 = vmatprep.subr.mxu1 %v366_v19 }
 0x11e   :  { %586 = vmatpush3.msra.mxu1 %v286_v20 }
 0x11f   :  { %587 = vmatprep.subr.mxu1 %v361_v21 }
 0x120   :  { %588 = vmatpush3.msra.mxu1 %v281_v22 }
 0x121   :  { %589 = vmatprep.subr.mxu1 %v356_v23 }
 0x122   :  { %590 = vmatpush3.msra.mxu1 %v276_v24 }
 0x123   :  { %591 = vmatprep.subr.mxu1 %v351_v25 }
 0x124   :  { %592 = vmatpush3.msra.mxu1 %v271_v26 }
 0x125   :  { %593 = vmatprep.subr.mxu1 %v346_v27 }
 0x126   :  { %594 = vmatpush3.msra.mxu1 %v266_v28 }
 0x127   :  { %595 = vmatprep.subr.mxu1 %v341_v29 }
 0x128   :  { %596 = vmatpush3.msra.mxu1 %v261_v30 }
 0x129   :  { %597 = vmatprep.subr.mxu1 %v336_v31 }
 0x12a   :  { %598 = vmatpush3.msra.mxu1 %v256_v32 }
 0x12b   :  { %599 = vmatprep.subr.mxu1 %v331_v33 }
 0x12c   :  { %600 = vmatpush3.msra.mxu1 %v251_v34 }
 0x12d   :  { %601 = vmatprep.subr.mxu1 %v326_v35 }
 0x12e   :  { %602 = vmatpush3.msra.mxu1 %v246_v37 }
 0x12f   :  { %603 = vmatprep.subr.mxu1 %v321_v40 }
 0x130   :  { %604 = vmatpush3.msra.mxu1 %v241_v42 }
 0x131   :  { %478 = vmatmul.mubr.f32.vlgmr.msra.gmra.mxu1 %v869_v36 }
 0x1f1   :  { %v605_v41 = vpop.f32.mrf.mxu1 }
 0x1f3   :  { %v606_v44 = vpop.f32.mrf.mxu1 }
 0x1f4   :  { %v607_v38 = vadd.f32 %v606_v44, %v605_v41 }
 0x1f6   :  { %v480_v45 = vadd.f32 %v607_v38, %v401_v43 }
 0x1f8   :  { %484 = vst.msk [vmem:[#allocation3] sm:$0x3] %vm483_vm1, %v480_v45 }
 0x1f9   :  { %676 = shalt.err (!%p673_p4)
}
 0x1fa   :  { %494 = dma.vmem_to_hbm [thread:$0]  %s492_s16, 32, %s949_s5, [#allocation4]  }
 0x1fb   :  { %685 = dma.done.wait [#allocation4], 32  }
 0x1fc   :  { %686 = vsyncadd [#allocation4], 4294967264 }
 0x1fd   :  { %498 = vsyncpa [#allocation4], 1 }

</bundles_post_ra>
